<compile_context>
chip_gen: v6e
topology: v6e:2x2x1
jax: 0.10.0
libtpu: 0.0.40
codegen_flags: <defaults>
</compile_context>

<pallas_src>
import jax
import jax.numpy as jnp
from jax.experimental import pallas as pl
from jax.experimental.pallas import tpu as pltpu

# Small, deterministic shapes implied by the module:
VOCAB, EMB, B, K = 64, 32, 8, 4


def _log_sigmoid(x):
    # Numerically stable, single-branch: logsigmoid(x) = -(max(-x,0) + log1p(exp(-|x|)))
    return -(jnp.maximum(-x, 0.0) + jnp.log1p(jnp.exp(-jnp.abs(x))))


def word2vec_loss_kernel(tgt_tbl_ref, ctx_tbl_ref,   # (VOCAB, EMB) tables, VMEM
                         tw_ref, cw_ref, neg_ref,    # (B,1), (B,1), (B,K) int32, VMEM
                         out_ref):                   # (1,1) f32 loss, SMEM
    vocab_iota = jax.lax.broadcasted_iota(jnp.int32, (B, VOCAB), 1)      # (B, VOCAB)

    # Vectorized one-hot gather matrices (no scalar-indexed dynamic slices).
    one_hot_t = (tw_ref[...] == vocab_iota).astype(jnp.float32)          # (B, VOCAB)
    one_hot_c = (cw_ref[...] == vocab_iota).astype(jnp.float32)          # (B, VOCAB)

    # Count matrix for negatives: counts[b, v] = #{k : neg[b, k] == v}.
    # The reference sums over K *before* logsigmoid, so the K-reduction is
    # hoisted into the gather (counts >= 1 for repeated indices is correct).
    neg_idx = neg_ref[...]                                                # (B, K)
    counts_n = (neg_idx[:, 0:1] == vocab_iota).astype(jnp.float32)
    for k in range(1, K):
        counts_n = counts_n + (neg_idx[:, k:k + 1] == vocab_iota).astype(jnp.float32)

    tgt_tbl = tgt_tbl_ref[...]                                            # (VOCAB, EMB)
    ctx_tbl = ctx_tbl_ref[...]                                            # (VOCAB, EMB)

    # Three tiny MXU matmuls replace the entire per-row copy chain.
    emb_t  = jnp.dot(one_hot_t, tgt_tbl, preferred_element_type=jnp.float32)  # (B, E)
    emb_c  = jnp.dot(one_hot_c, ctx_tbl, preferred_element_type=jnp.float32)  # (B, E)
    emb_ns = jnp.dot(counts_n,  ctx_tbl, preferred_element_type=jnp.float32)  # (B, E) = sum_k ctx[neg]

    pos_scores = jnp.sum(emb_t * emb_c,  axis=1, keepdims=True)           # (B, 1)
    neg_scores = jnp.sum(emb_t * emb_ns, axis=1, keepdims=True)           # (B, 1)

    # Fuse positive / negative paths: one logsigmoid pass + one global sum.
    scores = jnp.concatenate([pos_scores, -neg_scores], axis=1)           # (B, 2)
    loss = -jnp.sum(_log_sigmoid(scores))

    out_ref[0, 0] = loss


def word2vec_forward(target_table, context_table, target_word, context_word,
                     negative_example):
    """Pallas implementation of Word2Vec.forward. Returns scalar f32 loss."""
    tw2d = target_word.reshape(B, 1).astype(jnp.int32)
    cw2d = context_word.reshape(B, 1).astype(jnp.int32)
    neg2d = negative_example.reshape(B, K).astype(jnp.int32)

    vmem = pltpu.MemorySpace.VMEM
    out = pl.pallas_call(
        word2vec_loss_kernel,
        out_shape=jax.ShapeDtypeStruct((1, 1), jnp.float32),
        in_specs=[
            pl.BlockSpec(memory_space=vmem),   # target embedding table
            pl.BlockSpec(memory_space=vmem),   # context embedding table
            pl.BlockSpec(memory_space=vmem),   # target_word   (B, 1)
            pl.BlockSpec(memory_space=vmem),   # context_word  (B, 1)
            pl.BlockSpec(memory_space=vmem),   # negatives     (B, K)
        ],
        out_specs=pl.BlockSpec(memory_space=pltpu.MemorySpace.SMEM),
    )(target_table, context_table, tw2d, cw2d, neg2d)
    return out[0, 0]


def word2vec_forward_ref(target_table, context_table, target_word, context_word,
                         negative_example):
    """Pure-JAX reference with identical semantics, for validation."""
    emb_t = jnp.take(target_table, target_word, axis=0)
    emb_c = jnp.take(context_table, context_word, axis=0)
    emb_n = jnp.take(context_table, negative_example, axis=0)
    pos = jnp.sum(jax.nn.log_sigmoid(jnp.sum(emb_t * emb_c, axis=1)))
    neg_scores = jnp.sum(jnp.einsum('bke,be->bk', emb_n, emb_t), axis=1)
    neg = jnp.sum(jax.nn.log_sigmoid(-neg_scores))
    return -(pos + neg)


if __name__ == "__main__":
    key = jax.random.PRNGKey(0)
    k_tgt, k_ctx, k_tw, k_cw, k_neg = jax.random.split(key, 5)

    # nn.Embedding default init: N(0, 1)
    target_table = jax.random.normal(k_tgt, (VOCAB, EMB), dtype=jnp.float32)
    context_table = jax.random.normal(k_ctx, (VOCAB, EMB), dtype=jnp.float32)

    target_word = jax.random.randint(k_tw, (B,), 0, VOCAB, dtype=jnp.int32)
    context_word = jax.random.randint(k_cw, (B,), 0, VOCAB, dtype=jnp.int32)
    negative_example = jax.random.randint(k_neg, (B, K), 0, VOCAB, dtype=jnp.int32)

    loss = word2vec_forward(target_table, context_table, target_word,
                            context_word, negative_example)
    loss = jax.block_until_ready(loss)

    loss_ref = word2vec_forward_ref(target_table, context_table, target_word,
                                    context_word, negative_example)
    loss_ref = jax.block_until_ready(loss_ref)

    assert jnp.allclose(loss, loss_ref, rtol=1e-5, atol=1e-5), (loss, loss_ref)
    print("KERNEL_OK")
</pallas_src>

<mosaic_0001>
module attributes {stable_mosaic.version = 11 : i64} {
  func.func @word2vec_loss_kernel(%arg0: memref<64x32xf32, #tpu.memory_space<vmem>>, %arg1: memref<64x32xf32, #tpu.memory_space<vmem>>, %arg2: memref<8x1xi32, #tpu.memory_space<vmem>>, %arg3: memref<8x1xi32, #tpu.memory_space<vmem>>, %arg4: memref<8x4xi32, #tpu.memory_space<vmem>>, %arg5: memref<1x1xf32, #tpu.memory_space<smem>>) attributes {dimension_semantics = [], scalar_prefetch = 0 : i64, scratch_operands = 0 : i64, tpu.core_type = #tpu.core_type<tc>} {
    %0 = tpu.iota {dimensions = array<i32: 1>} : vector<8x64xi32>
    %c0 = arith.constant 0 : index
    %c0_0 = arith.constant 0 : index
    %1 = vector.load %arg2[%c0, %c0_0] : memref<8x1xi32, #tpu.memory_space<vmem>>, vector<8x1xi32>
    %2 = vector.broadcast %1 : vector<8x1xi32> to vector<8x64xi32>
    %3 = arith.cmpi eq, %2, %0 : vector<8x64xi32>
    %4 = arith.extui %3 : vector<8x64xi1> to vector<8x64xi32>
    %5 = arith.sitofp %4 : vector<8x64xi32> to vector<8x64xf32>
    %c0_1 = arith.constant 0 : index
    %c0_2 = arith.constant 0 : index
    %6 = vector.load %arg3[%c0_1, %c0_2] : memref<8x1xi32, #tpu.memory_space<vmem>>, vector<8x1xi32>
    %7 = vector.broadcast %6 : vector<8x1xi32> to vector<8x64xi32>
    %8 = arith.cmpi eq, %7, %0 : vector<8x64xi32>
    %9 = arith.extui %8 : vector<8x64xi1> to vector<8x64xi32>
    %10 = arith.sitofp %9 : vector<8x64xi32> to vector<8x64xf32>
    %c0_3 = arith.constant 0 : index
    %c0_4 = arith.constant 0 : index
    %11 = vector.load %arg4[%c0_3, %c0_4] : memref<8x4xi32, #tpu.memory_space<vmem>>, vector<8x4xi32>
    %12 = vector.extract_strided_slice %11 {offsets = [0, 0], sizes = [8, 1], strides = [1, 1]} : vector<8x4xi32> to vector<8x1xi32>
    %13 = vector.broadcast %12 : vector<8x1xi32> to vector<8x64xi32>
    %14 = arith.cmpi eq, %13, %0 : vector<8x64xi32>
    %15 = arith.extui %14 : vector<8x64xi1> to vector<8x64xi32>
    %16 = arith.sitofp %15 : vector<8x64xi32> to vector<8x64xf32>
    %17 = vector.extract_strided_slice %11 {offsets = [0, 1], sizes = [8, 1], strides = [1, 1]} : vector<8x4xi32> to vector<8x1xi32>
    %18 = vector.broadcast %17 : vector<8x1xi32> to vector<8x64xi32>
    %19 = arith.cmpi eq, %18, %0 : vector<8x64xi32>
    %20 = arith.extui %19 : vector<8x64xi1> to vector<8x64xi32>
    %21 = arith.sitofp %20 : vector<8x64xi32> to vector<8x64xf32>
    %22 = arith.addf %16, %21 : vector<8x64xf32>
    %23 = vector.extract_strided_slice %11 {offsets = [0, 2], sizes = [8, 1], strides = [1, 1]} : vector<8x4xi32> to vector<8x1xi32>
    %24 = vector.broadcast %23 : vector<8x1xi32> to vector<8x64xi32>
    %25 = arith.cmpi eq, %24, %0 : vector<8x64xi32>
    %26 = arith.extui %25 : vector<8x64xi1> to vector<8x64xi32>
    %27 = arith.sitofp %26 : vector<8x64xi32> to vector<8x64xf32>
    %28 = arith.addf %22, %27 : vector<8x64xf32>
    %29 = vector.extract_strided_slice %11 {offsets = [0, 3], sizes = [8, 1], strides = [1, 1]} : vector<8x4xi32> to vector<8x1xi32>
    %30 = vector.broadcast %29 : vector<8x1xi32> to vector<8x64xi32>
    %31 = arith.cmpi eq, %30, %0 : vector<8x64xi32>
    %32 = arith.extui %31 : vector<8x64xi1> to vector<8x64xi32>
    %33 = arith.sitofp %32 : vector<8x64xi32> to vector<8x64xf32>
    %34 = arith.addf %28, %33 : vector<8x64xf32>
    %c0_5 = arith.constant 0 : index
    %c0_6 = arith.constant 0 : index
    %35 = vector.load %arg0[%c0_5, %c0_6] : memref<64x32xf32, #tpu.memory_space<vmem>>, vector<64x32xf32>
    %c0_7 = arith.constant 0 : index
    %c0_8 = arith.constant 0 : index
    %36 = vector.load %arg1[%c0_7, %c0_8] : memref<64x32xf32, #tpu.memory_space<vmem>>, vector<64x32xf32>
    %cst = arith.constant dense<0.000000e+00> : vector<8x32xf32>
    %37 = tpu.matmul %5, %35, %cst {dimension_numbers = #tpu.dot_dimension_numbers<[1], [0], [0], [1], [0, 0, 1, 1], [], []>} : vector<8x64xf32>, vector<64x32xf32>, vector<8x32xf32> -> vector<8x32xf32>
    %cst_9 = arith.constant dense<0.000000e+00> : vector<8x32xf32>
    %38 = tpu.matmul %10, %36, %cst_9 {dimension_numbers = #tpu.dot_dimension_numbers<[1], [0], [0], [1], [0, 0, 1, 1], [], []>} : vector<8x64xf32>, vector<64x32xf32>, vector<8x32xf32> -> vector<8x32xf32>
    %cst_10 = arith.constant dense<0.000000e+00> : vector<8x32xf32>
    %39 = tpu.matmul %34, %36, %cst_10 {dimension_numbers = #tpu.dot_dimension_numbers<[1], [0], [0], [1], [0, 0, 1, 1], [], []>} : vector<8x64xf32>, vector<64x32xf32>, vector<8x32xf32> -> vector<8x32xf32>
    %40 = arith.mulf %37, %38 : vector<8x32xf32>
    %cst_11 = arith.constant dense<0.000000e+00> : vector<8xf32>
    %41 = vector.multi_reduction <add>, %40, %cst_11 [1] : vector<8x32xf32> to vector<8xf32>
    %42 = vector.shape_cast %41 : vector<8xf32> to vector<8x1xf32>
    %43 = arith.mulf %37, %39 : vector<8x32xf32>
    %cst_12 = arith.constant dense<0.000000e+00> : vector<8xf32>
    %44 = vector.multi_reduction <add>, %43, %cst_12 [1] : vector<8x32xf32> to vector<8xf32>
    %45 = vector.shape_cast %44 : vector<8xf32> to vector<8x1xf32>
    %cst_13 = arith.constant 0.000000e+00 : f32
    %46 = vector.broadcast %cst_13 : f32 to vector<8x1xf32>
    %47 = arith.subf %46, %45 : vector<8x1xf32>
    %48 = tpu.concatenate %42, %47 in 1 : vector<8x1xf32>, vector<8x1xf32> -> vector<8x2xf32>
    %cst_14 = arith.constant 0.000000e+00 : f32
    %49 = vector.broadcast %cst_14 : f32 to vector<8x2xf32>
    %50 = arith.subf %49, %48 : vector<8x2xf32>
    %cst_15 = arith.constant 0.000000e+00 : f32
    %51 = vector.broadcast %cst_15 : f32 to vector<8x2xf32>
    %52 = arith.maximumf %50, %51 : vector<8x2xf32>
    %53 = math.absf %48 : vector<8x2xf32>
    %cst_16 = arith.constant 0.000000e+00 : f32
    %54 = vector.broadcast %cst_16 : f32 to vector<8x2xf32>
    %55 = arith.subf %54, %53 : vector<8x2xf32>
    %56 = math.exp %55 : vector<8x2xf32>
    %57 = math.log1p %56 : vector<8x2xf32>
    %58 = arith.addf %52, %57 : vector<8x2xf32>
    %cst_17 = arith.constant 0.000000e+00 : f32
    %59 = vector.broadcast %cst_17 : f32 to vector<8x2xf32>
    %60 = arith.subf %59, %58 : vector<8x2xf32>
    %61 = vector.shape_cast %60 : vector<8x2xf32> to vector<1x8x2xf32>
    %cst_18 = arith.constant dense<0.000000e+00> : vector<1xf32>
    %62 = vector.multi_reduction <add>, %61, %cst_18 [1, 2] : vector<1x8x2xf32> to vector<1xf32>
    %63 = vector.shape_cast %62 : vector<1xf32> to vector<1x1x1xf32>
    %64 = vector.extract %63[0, 0, 0] : f32 from vector<1x1x1xf32>
    %cst_19 = arith.constant 0.000000e+00 : f32
    %65 = arith.subf %cst_19, %64 : f32
    %c0_20 = arith.constant 0 : index
    %c0_21 = arith.constant 0 : index
    %66 = memref.load %arg5[%c0_20, %c0_21] : memref<1x1xf32, #tpu.memory_space<smem>>
    memref.store %65, %arg5[%c0_20, %c0_21] : memref<1x1xf32, #tpu.memory_space<smem>>
    return
  }
}

</mosaic_0001>

<bundles_post_ra>
// kernel: tpu_custom_call.1
= control target key start
LH: loop header
LB: loop body
LE: loop exit
PB: predicated region body
PF: predicated region fallthrough
CT: control target
= control target key end

     0   :  { %v478_v2 = vmov 1   ;;  %v479_v3 = vmov 0   ;;  %v480_v5 = vmov 0.0   ;;  %v481_v9 = vmov 2   ;;  %s622_s0 = inlined_call_operand.vmem [shape: f32[64,32], index: 0, kind: input, shape index: {}]   ;;  %s623_s1 = inlined_call_operand.vmem [shape: f32[64,32], index: 1, kind: input, shape index: {}]   ;;  %s624_s2 = inlined_call_operand.vmem [shape: s32[8,1], index: 2, kind: input, shape index: {}]   ;;  %s625_s3 = inlined_call_operand.vmem [shape: s32[8,1], index: 3, kind: input, shape index: {}]   ;;  %s626_s4 = inlined_call_operand.vmem [shape: s32[8,4], index: 4, kind: input, shape index: {}]   ;;  %s627_s5 = inlined_call_operand.hbm [shape: f32[1,1], index: 5, kind: output, shape index: {}]  }
   0x1   :  { %v37_v0 = vld [vmem:[%s626_s4] sm:$0xff]  ;;  %460 = vset.pattern.permute.xlu1 %v478_v2  ;;  %459 = vset.pattern.permute.xlu0 %v479_v3  ;;  %v72_v4 = vld [vmem:[%s622_s0 + $0x38] sm:$0xff]  ;;  %v71_v7 = vld [vmem:[%s622_s0 + $0x30] sm:$0xff] }
   0x2   :  { %v23_v1 = vld [vmem:[%s624_s2] sm:$0xff]  ;;  %45 = vperm.xlu1 %460, %v37_v0   ;;  %393 = vmatprep.subr.mxu0 %v480_v5  ;;  %v529_v6 = vld [vmem:[%s623_s1 + $0x38] sm:$0xff]  ;;  %v540_v8 = vld [vmem:[%s623_s1 + $0x30] sm:$0xff] }
   0x3   :  { %25 = vperm.xlu0 %459, %v23_v1   ;;  %412 = vmatprep.subr.mxu1 %v480_v5  ;;  %v70_v10 = vld [vmem:[%s622_s0 + $0x28] sm:$0xff] }
   0x4   :  { %394 = vmatpush3.msra.mxu0 %v72_v4  ;;  %413 = vmatpush3.msra.mxu1 %v529_v6 }
   0x5   :  { %395 = vmatprep.subr.mxu0 %v480_v5  ;;  %414 = vmatprep.subr.mxu1 %v480_v5 }
   0x6   :  { %461 = vset.pattern.permute.xlu1 %v481_v9 }
   0x7   :  { %39 = vperm.xlu0 %459, %v37_v0  }
   0x8   :  { %10 = vsyncpa [#allocation3], 0  ;;  %52 = vperm.xlu1 %461, %v37_v0   ;;  %396 = vmatpush3.msra.mxu0 %v71_v7  ;;  %v30_v11 = vld [vmem:[%s625_s3] sm:$0xff]  ;;  %v482_v13 = vmov 3   ;;  %v68_v14 = vld [vmem:[%s622_s0 + $0x18] sm:$0xff]  ;;  %vm483_vm0 = vmmov 0   ;;  %v21_v24 = vlaneseq }
   0x9   :  { %397 = vmatprep.subr.mxu0 %v480_v5  ;;  %415 = vmatpush3.msra.mxu1 %v540_v8  ;;  %v69_v12 = vld [vmem:[%s622_s0 + $0x20] sm:$0xff]  ;;  %v78_v15 = vld [vmem:[%s623_s1 + $0x28] sm:$0xff]  ;;  %v67_v16 = vld [vmem:[%s622_s0 + $0x10] sm:$0xff]  ;;  %vm81_vm1 = vcmask 523264   ;;  %vm302_vm8 = vcmask 261120   ;;  %vm311_vm9 = vcmask 7168  }
   0xa   :  { %398 = vmatpush3.msra.mxu0 %v70_v10  ;;  %416 = vmatprep.subr.mxu1 %v480_v5  ;;  %v77_v17 = vld [vmem:[%s623_s1 + $0x20] sm:$0xff]  ;;  %v66_v18 = vld [vmem:[%s622_s0 + $0x8] sm:$0xff]  ;;  %v76_v19 = vld [vmem:[%s623_s1 + $0x18] sm:$0xff]  ;;  %v22_v25 = vand.u32 127, %v21_v24  ;;  %vm330_vm11 = vcmask 15360   ;;  %s484_s26 = smov [#allocation2]  }
   0xb   :  { %462 = vset.pattern.permute.xlu0 %v482_v13  ;;  %399 = vmatprep.subr.mxu0 %v480_v5  ;;  %v65_v20 = vld [vmem:[%s622_s0] sm:$0xff]  ;;  %v75_v21 = vld [vmem:[%s623_s1 + $0x10] sm:$0xff]  ;;  %v74_v22 = vld [vmem:[%s623_s1 + $0x8] sm:$0xff] }
   0xc   :  { %463 = vset.pattern.permute.xlu1 %v479_v3  ;;  %59 = vperm.xlu0 %462, %v37_v0   ;;  %v73_v23 = vld [vmem:[%s623_s1] sm:$0xff] }
   0xd   :  { %32 = vperm.xlu1 %463, %v30_v11   ;;  %400 = vmatpush3.msra.mxu0 %v69_v12 }
   0xe   :  { %401 = vmatprep.subr.mxu0 %v480_v5  ;;  %409 = vmatprep.mubr.msk.f32.mxu0 %vm483_vm0, %v480_v5 }
   0xf   :  { %402 = vmatpush3.msra.mxu0 %v68_v14  ;;  %417 = vmatpush3.msra.mxu1 %v78_v15 }
  0x10   :  { %403 = vmatprep.subr.mxu0 %v480_v5  ;;  %418 = vmatprep.subr.mxu1 %v480_v5 }
  0x11   :  { %404 = vmatpush3.msra.mxu0 %v67_v16  ;;  %419 = vmatpush3.msra.mxu1 %v77_v17 }
  0x12   :  { %405 = vmatprep.subr.mxu0 %v480_v5  ;;  %420 = vmatprep.subr.mxu1 %v480_v5 }
  0x13   :  { %406 = vmatpush3.msra.mxu0 %v66_v18  ;;  %421 = vmatpush3.msra.mxu1 %v76_v19 }
  0x14   :  { %407 = vmatprep.subr.mxu0 %v480_v5  ;;  %422 = vmatprep.subr.mxu1 %v480_v5 }
  0x15   :  { %408 = vmatpush3.msra.mxu0 %v65_v20  ;;  %423 = vmatpush3.msra.mxu1 %v75_v21 }
  0x16   :  { %431 = vmatprep.subr.mxu0 %v480_v5  ;;  %424 = vmatprep.subr.mxu1 %v480_v5 }
  0x17   :  { %425 = vmatpush3.msra.mxu1 %v74_v22  ;;  %428 = vmatprep.mubr.msk.f32.mxu1 %vm483_vm0, %v480_v5 }
  0x18   :  { %426 = vmatprep.subr.mxu1 %v480_v5 }
  0x19   :  { %427 = vmatpush3.msra.mxu1 %v73_v23 }
  0x7d   :  { %v46_v27 = vpop.permute.xlu1 %45 }
  0x7e   :  { %v26_v26 = vpop.permute.xlu0 %25  ;;  %vm47_vm3 = vcmp.eq.s32.totalorder %v46_v27, %v22_v25 }
  0x7f   :  { %vm27_vm2 = vcmp.eq.s32.totalorder %v26_v26, %v22_v25  ;;  %v360_v31 = vsel %vm47_vm3, 1.0, %v480_v5 }
  0x80   :  { %v357_v28 = vsel %vm27_vm2, 1.0, %v480_v5 }
  0x81   :  { %410 = vmatmul.mubr.msk.f32.vlgmr.msra.gmra.mxu0 %vm81_vm1, %v357_v28 }
  0x82   :  { %432 = vmatpush3.msra.mxu0 %v529_v6  ;;  %v40_v29 = vpop.permute.xlu0 %39  ;;  %447 = vmatprep.mubr.msk.f32.mxu0 %vm483_vm0, %v480_v5 }
  0x83   :  { %vm41_vm4 = vcmp.eq.s32.totalorder %v40_v29, %v22_v25  ;;  %433 = vmatprep.subr.mxu0 %v480_v5  ;;  %v53_v30 = vpop.permute.xlu1 %52 }
  0x84   :  { %v359_v32 = vsel %vm41_vm4, 1.0, %v480_v5  ;;  %434 = vmatpush3.msra.mxu0 %v540_v8  ;;  %vm54_vm5 = vcmp.eq.s32.totalorder %v53_v30, %v22_v25 }
  0x85   :  { %435 = vmatprep.subr.mxu0 %v480_v5  ;;  %v50_v33 = vadd.f32 %v360_v31, %v359_v32  ;;  %v361_v35 = vsel %vm54_vm5, 1.0, %v480_v5 }
  0x86   :  { %436 = vmatpush3.msra.mxu0 %v78_v15 }
  0x87   :  { %437 = vmatprep.subr.mxu0 %v480_v5  ;;  %v60_v34 = vpop.permute.xlu0 %59  ;;  %v57_v38 = vadd.f32 %v361_v35, %v50_v33 }
  0x88   :  { %438 = vmatpush3.msra.mxu0 %v77_v17  ;;  %v33_v36 = vpop.permute.xlu1 %32  ;;  %vm61_vm6 = vcmp.eq.s32.totalorder %v60_v34, %v22_v25 }
  0x89   :  { %vm34_vm7 = vcmp.eq.s32.totalorder %v33_v36, %v22_v25  ;;  %439 = vmatprep.subr.mxu0 %v480_v5  ;;  %v362_v39 = vsel %vm61_vm6, 1.0, %v480_v5 }
  0x8a   :  { %v358_v37 = vsel %vm34_vm7, 1.0, %v480_v5  ;;  %440 = vmatpush3.msra.mxu0 %v76_v19  ;;  %v64_v40 = vadd.f32 %v362_v39, %v57_v38 }
  0x8b   :  { %441 = vmatprep.subr.mxu0 %v480_v5  ;;  %429 = vmatmul.mubr.msk.f32.vlgmr.msra.gmra.mxu1 %vm81_vm1, %v358_v37 }
  0x8c   :  { %442 = vmatpush3.msra.mxu0 %v75_v21 }
  0x8d   :  { %443 = vmatprep.subr.mxu0 %v480_v5 }
  0x8e   :  { %444 = vmatpush3.msra.mxu0 %v74_v22 }
  0x8f   :  { %445 = vmatprep.subr.mxu0 %v480_v5 }
  0x90   :  { %446 = vmatpush3.msra.mxu0 %v73_v23 }
  0x91   :  { %448 = vmatmul.mubr.msk.f32.vlgmr.msra.gmra.mxu0 %vm81_vm1, %v64_v40 }
 0x141   :  { %v151_v41 = vpop.f32.mrf.mxu0 }
 0x143   :  { %v411_v42 = vpop.f32.mrf.mxu0 }
 0x14b   :  { %v224_v43 = vpop.f32.mrf.mxu1 }
 0x14c   :  { %v301_v44 = vmul.f32 %v224_v43, %v151_v41 }
 0x14d   :  { %v430_v45 = vpop.f32.mrf.mxu1 }
 0x14e   :  { %v303_v46 = vsel %vm302_vm8, %v301_v44, 0.0 }
 0x14f   :  { %304 = vadd.xlane.f32.xlu0 %v303_v46 }
 0x151   :  { %v297_v47 = vpop.f32.mrf.mxu0 }
 0x152   :  { %v306_v48 = vmul.f32 %v297_v47, %v151_v41 }
 0x153   :  { %v449_v49 = vpop.f32.mrf.mxu0 }
 0x154   :  { %v307_v50 = vsel %vm302_vm8, %v306_v48, 0.0 }
 0x155   :  { %308 = vadd.xlane.f32.xlu1 %v307_v50 }
 0x1d8   :  { %v305_v53 = vpop.xlane.xlu0 %304 }
 0x1de   :  { %v309_v51 = vpop.xlane.xlu1 %308 }
 0x1df   :  { %v310_v52 = vsub.f32 0.0, %v309_v51 }
 0x1e1   :  { %v312_v54 = vsel %vm311_vm9, %v305_v53, %v310_v52 }
 0x1e2   :  { %v315_v55 = vand.u32 2147483647, %v312_v54  ;;  %v313_v62 = vsub.f32 0.0, %v312_v54 }
 0x1e4   :  { %v316_v56 = vsub.f32 0.0, %v315_v55  ;;  %v314_v3 = vmax.f32 %v313_v62, 0.0 }
 0x1e6   :  { %v317_v57 = vmul.f32 1.442695, %v316_v56 }
 0x1e8   :  { %464 = vpow2.f32 %v317_v57 }
 0x1f5   :  { %v465_v58 = vpop.eup %464 }
 0x1f6   :  { %v319_v59 = vadd.f32 1.0, %v465_v58  ;;  %v322_v60 = vmul.f32 -0.5, %v465_v58  ;;  %v325_v63 = vand.u32 2147483647, %v465_v58 }
 0x1f8   :  { %466 = vlog2.f32 %v319_v59  ;;  %v323_v61 = vadd.f32 1.0, %v322_v60  ;;  %vm326_vm10 = vcmp.lt.f32.partialorder %v325_v63, 0.0004427343 }
 0x1fa   :  { %v324_v2 = vmul.f32 %v465_v58, %v323_v61 }
 0x205   :  { %v467_v0 = vpop.eup %466 }
 0x206   :  { %v321_v1 = vmul.f32 0.6931472, %v467_v0 }
 0x208   :  { %v327_v4 = vsel %vm326_vm10, %v324_v2, %v321_v1 }
 0x209   :  { %v328_v5 = vadd.f32 %v327_v4, %v314_v3 }
 0x20b   :  { %v329_v6 = vsub.f32 0.0, %v328_v5 }
 0x20d   :  { %v331_v7 = vsel %vm330_vm11, %v329_v6, 0.0 }
 0x20e   :  { %332 = vadd.xlane.f32.xlu0 %v331_v7 }
 0x297   :  { %v333_v8 = vpop.xlane.xlu0 %332 }
 0x298   :  { %v334_v9 = vrot.slane %v333_v8, 4 }
 0x29a   :  { %v335_v10 = vadd.f32 %v334_v9, %v333_v8 }
 0x29c   :  { %v336_v11 = vrot.slane %v335_v10, 2 }
 0x29e   :  { %v337_v12 = vadd.f32 %v336_v11, %v335_v10 }
 0x2a0   :  { %v338_v13 = vrot.slane %v337_v12, 1 }
 0x2a2   :  { %v339_v14 = vadd.f32 %v338_v13, %v337_v12 }
 0x2a4   :  { %450 = vpush %v339_v14 }
 0x2d5   :  { %s451_s1 = spop %450 }
 0x2d6   :  { %s341_s25 = ssub.f32 0.0, %s451_s1 }
 0x2d8   :  { %343 = sst [smem:[#allocation2]] %s341_s25 }
 0x2d9   :  { %351 = dma.smem_to_hbm %s484_s26, 16, %s627_s5, [#allocation3]  }
 0x2da   :  { %476 = dma.done.wait [#allocation3], 16  }
 0x2db   :  { %477 = vsyncadd [#allocation3], 4294967280 }
 0x2dc   :  { %355 = sfence }
 0x2dd   :  { %356 = vsyncpa [#allocation3], 1 }

</bundles_post_ra>
